<compile_context>
chip_gen: v5e
topology: v5e:2x2
jax: 0.10.0
libtpu: 0.0.40
codegen_flags: <defaults>
</compile_context>

<pallas_src>
import functools

import jax
import jax.numpy as jnp
from jax.experimental import pallas as pl
from jax.experimental.pallas import tpu as pltpu

_SUBLANE = 8
_LANE = 128


def _round_up(n: int, m: int) -> int:
    return ((n + m - 1) // m) * m


def _vmem_cap_bytes() -> int:
    """Conservative per-core VMEM budget (v5e/v6e: 128 MiB phys, v7x: 64 MiB)."""
    try:
        phys = pltpu.get_tpu_info().vmem_capacity_bytes
    except Exception:
        phys = 64 * 1024 * 1024          # assume the smallest (v7x) if unknown
    return min(int(phys * 3 // 4), 100 * 1024 * 1024)


@functools.cache
def _single_buffer_supported() -> bool:
    """Probe whether pipeline_mode=pl.Buffered(1) compiles & is correct here.

    Grid-invariant coefficient operands only need one VMEM buffer; default
    BlockSpec pipelining allocates two.  Buffered(1) halves the resident
    footprint of C (decisive for large d on v7x's 64 MiB VMEM); fall back
    gracefully if this jax/libtpu build rejects it.
    """
    def k(a_ref, b_ref, o_ref):
        o_ref[...] = a_ref[...] + b_ref[...]

    try:
        fn = pl.pallas_call(
            k,
            out_shape=jax.ShapeDtypeStruct((8, 256), jnp.float32),
            grid=(2,),
            in_specs=[pl.BlockSpec((8, 128), lambda i: (0, i)),
                      pl.BlockSpec((8, 128), lambda i: (0, 0),
                                   pipeline_mode=pl.Buffered(1))],
            out_specs=pl.BlockSpec((8, 128), lambda i: (0, i)),
        )
        a = jnp.arange(8 * 256, dtype=jnp.float32).reshape(8, 256)
        b = jnp.full((8, 128), 3.0, dtype=jnp.float32)
        out = jax.block_until_ready(fn(a, b))
        expected = a + jnp.concatenate([b, b], axis=1)
        return bool(jnp.allclose(out, expected))
    except Exception:
        return False


def _choose_batch_tile(B, d, x_item, resident_bytes, vmem_cap, block_rows):
    """Rows per grid step: target ~2 MiB of x per tile (amortizes the ~0.35us
    per-step overhead), 128/256-row aligned when multi-tiled, bounded so the
    whole buffer set fits under vmem_cap."""
    per_row = 2 * d * x_item + 2 * 4            # double-buffered x + f32 out row
    budget = max(per_row * _SUBLANE, vmem_cap - resident_bytes - (4 << 20))
    tb_cap = max(_SUBLANE, budget // per_row)
    if block_rows is not None:
        tb_want = int(block_rows)
    else:
        tb_want = max(_SUBLANE, (2 << 20) // max(1, d * x_item))
    tb = int(min(tb_want, tb_cap))
    if tb >= B:
        return _round_up(B, _SUBLANE)           # single tile covers the batch
    if tb >= 512:
        tb = (tb // 256) * 256                  # prefer 256-row MXU M-alignment
    else:
        tb = max(_LANE, (tb // _LANE) * _LANE)  # lane-dense out needs tb % 128 == 0
    return tb


def _make_taylor_kernel(num_monomials: int):
    """Kernel for num_monomials in {2, 3}: constant + linear [+ quadratic]."""

    def kernel(c0_ref, x_ref, c1_ref, *rest):
        if num_monomials >= 3:
            c2_ref, o_ref = rest
        else:
            c2_ref = None
            (o_ref,) = rest

        x = x_ref[...]                      # (tb, d) in the streamed dtype — no pre-cast
        z = c1_ref[...]                     # (1, d) f32; offsets already folded in

        if num_monomials >= 3:
            # Streamed dtype straight into the MXU (bf16 x bf16 fast path when
            # streaming bf16), accumulate in f32.
            z = z + jnp.dot(x, c2_ref[...], preferred_element_type=jnp.float32)

        # total_b = c0' + sum_e x[b,e] * (c1'[e] + (x C)[b,e]) = c0' + c1'.x + x^T C x
        # Mixed-precision elementwise multiply: promotion happens per-vreg.
        row = jnp.sum(x * z, axis=-1) + c0_ref[0]        # (tb,) f32
        o_ref[0, :] = row.astype(o_ref.dtype)            # lane-dense (1, tb) store

    return kernel


@functools.partial(
    jax.jit,
    static_argnames=("x_dtype", "tb", "b_pad", "vmem_limit", "single_buffer"))
def _taylor_forward_impl(x, offsets, coeffs, *, x_dtype, tb, b_pad,
                         vmem_limit, single_buffer):
    num_monomials = len(coeffs)
    B, d = x.shape

    offsets = offsets.astype(jnp.float32).reshape(d)
    c0 = coeffs[0].astype(jnp.float32).reshape(())
    c1 = coeffs[1].astype(jnp.float32).reshape(d)

    # Fold taylor_offsets into the coefficients (one-time precompute):
    #   c0' = c0 - c1.o + o^T C o,   c1' = c1 - (C + C^T) o,   C unchanged.
    if num_monomials >= 3:
        C = coeffs[2].astype(jnp.float32)
        c_o = C @ offsets
        c0_f = c0 - jnp.dot(c1, offsets) + jnp.dot(offsets, c_o)
        c1_f = c1 - c_o - C.T @ offsets
        C_res = C.astype(x_dtype)        # resident MXU operand in the streaming dtype
    else:
        C_res = None
        c0_f = c0 - jnp.dot(c1, offsets)
        c1_f = c1

    # Stream x in x_dtype; skip the cast (an extra HBM pass) when it is a no-op.
    x_s = x if x.dtype == x_dtype else x.astype(x_dtype)
    if b_pad != B:
        # Only pad when ragged w.r.t. the tile; zero rows evaluate to c0' and
        # are sliced off below (finite, so no NaN-checker surprises).
        x_s = jnp.pad(x_s, ((0, b_pad - B), (0, 0)))
    num_tiles = b_pad // tb

    coeff_mode = pl.Buffered(1) if single_buffer else None

    ins = [c0_f.reshape(1), x_s, c1_f.reshape(1, d)]
    in_specs = [
        pl.BlockSpec(memory_space=pltpu.MemorySpace.SMEM),              # c0' scalar
        pl.BlockSpec((tb, d), lambda i: (i, 0)),                        # x tile (pipelined)
        pl.BlockSpec((1, d), lambda i: (0, 0), pipeline_mode=coeff_mode),  # c1' (resident)
    ]
    if num_monomials >= 3:
        # TODO(synk): for d so large that even a single bf16 C (2*d^2 bytes)
        # cannot sit next to the x tiles (d >~ 5K on v7x's 64 MiB VMEM), tile
        # the reduction dim with a 2-D (batch, K) grid + f32 accumulator
        # (pl.when init/finalize).
        ins.append(C_res)
        in_specs.append(pl.BlockSpec((d, d), lambda i: (0, 0),
                                     pipeline_mode=coeff_mode))         # C (resident)

    out = pl.pallas_call(
        _make_taylor_kernel(num_monomials),
        out_shape=jax.ShapeDtypeStruct((1, b_pad), jnp.float32),
        grid=(num_tiles,),
        in_specs=in_specs,
        out_specs=pl.BlockSpec((1, tb), lambda i: (0, i)),
        compiler_params=pltpu.CompilerParams(
            # TODO(synk): on v7x verify via xprof that both TensorCores get
            # batch tiles; if not, switch to pltpu.CORE_PARALLEL / pl.core_map.
            dimension_semantics=("parallel",),
            vmem_limit_bytes=vmem_limit),
    )(*ins)
    return out[0, :B]


def taylor_net_forward(x, offsets, coeffs, *, stream_dtype=None, block_rows=None):
    """Pallas implementation of TaylorNet.forward.

    x: (B, d); offsets: (d,); coeffs: sequence with shapes (), (d,), (d, d)
    (len == num_taylor_monomials).  Returns (B,) float32.

    stream_dtype: dtype x is streamed HBM->VMEM in.  Default None = x.dtype
    (exact, no extra HBM pass).  Pass jnp.bfloat16 to halve x HBM traffic and
    use the fast bf16 MXU path (~1e-2 relative error).
    block_rows: optional batch-tile override (mainly for testing).
    """
    coeffs = tuple(coeffs)
    num_monomials = len(coeffs)
    if num_monomials == 1:
        # PyTorch forward never enters the loop -> returns the bare scalar
        # coefficient (0-d, not (B,)), matching the module's behavior.
        return coeffs[0]
    if num_monomials > 3:
        # TODO(synk): monomials of order >= 3 (rank-3+ coefficient tensors /
        # the general einsum chain) are not implemented in-kernel.
        raise NotImplementedError("num_taylor_monomials > 3 not implemented")

    B, d = x.shape
    x_dtype = jnp.dtype(x.dtype if stream_dtype is None else stream_dtype)
    x_item = x_dtype.itemsize

    single_buffer = _single_buffer_supported()
    n_coeff_buf = 1 if single_buffer else 2
    c_bytes = d * d * x_item if num_monomials >= 3 else 0
    resident_bytes = n_coeff_buf * (c_bytes + d * 4)

    vmem_cap = _vmem_cap_bytes()
    tb = _choose_batch_tile(B, d, x_item, resident_bytes, vmem_cap, block_rows)
    b_pad = _round_up(B, tb)

    # Explicit VMEM limit computed from the real buffer set (2x x tile +
    # resident coefficients + double-buffered out row) with slack for compiler
    # internal scratch, capped per generation via _vmem_cap_bytes().
    vmem_needed = resident_bytes + 2 * tb * d * x_item + 2 * tb * 4
    vmem_limit = int(min(vmem_cap,
                         max(vmem_needed * 5 // 4 + (2 << 20), 16 << 20)))

    return _taylor_forward_impl(x, offsets, coeffs,
                                x_dtype=x_dtype, tb=tb, b_pad=b_pad,
                                vmem_limit=vmem_limit,
                                single_buffer=single_buffer)


def taylor_net_reference(x, offsets, coeffs):
    """Pure-JAX reference mirroring the PyTorch einsum loop."""
    rx = x - offsets
    out = coeffs[0]
    if len(coeffs) >= 2:
        out = out + jnp.einsum('bd,d->b', rx, coeffs[1])
    if len(coeffs) >= 3:
        out = out + jnp.einsum('bd,be,de->b', rx, rx, coeffs[2])
    return out


if __name__ == "__main__":
    input_dim = 16
    B = 8

    key = jax.random.PRNGKey(0)
    k_x, k_off, k0, k1, k2, k_x2 = jax.random.split(key, 6)

    x = jax.random.normal(k_x, (B, input_dim), dtype=jnp.float32)
    taylor_offsets = jax.random.normal(k_off, (input_dim,), dtype=jnp.float32)
    taylor_coefficients = [
        jax.random.normal(k0, (), dtype=jnp.float32),                      # monomial_0
        jax.random.normal(k1, (input_dim,), dtype=jnp.float32),            # monomial_1
        jax.random.normal(k2, (input_dim, input_dim), dtype=jnp.float32),  # monomial_2
    ]

    # 1) default path (streams x in its own dtype == f32): exact vs reference.
    out = taylor_net_forward(x, taylor_offsets, taylor_coefficients)
    jax.block_until_ready(out)
    ref = taylor_net_reference(x, taylor_offsets, taylor_coefficients)
    assert out.shape == (B,), out.shape
    assert jnp.allclose(out, ref, rtol=1e-3, atol=1e-3), (out, ref)

    # 2) opt-in bf16 streaming (fast bf16 MXU path): compare against the
    #    reference on the same bf16-quantized x with a relative-L2 check
    #    (bf16 changes numerics at the ~1e-2 level by construction).
    out_bf16 = taylor_net_forward(x, taylor_offsets, taylor_coefficients,
                                  stream_dtype=jnp.bfloat16)
    jax.block_until_ready(out_bf16)
    x_q = x.astype(jnp.bfloat16).astype(jnp.float32)
    ref_q = taylor_net_reference(x_q, taylor_offsets, taylor_coefficients)
    rel = jnp.linalg.norm(out_bf16 - ref_q) / jnp.linalg.norm(ref_q)
    assert rel < 5e-2, (rel, out_bf16, ref_q)

    # 3) constant + linear only (num_taylor_monomials == 2).
    out_lin = taylor_net_forward(x, taylor_offsets, taylor_coefficients[:2])
    ref_lin = taylor_net_reference(x, taylor_offsets, taylor_coefficients[:2])
    assert jnp.allclose(out_lin, ref_lin, rtol=1e-3, atol=1e-3), (out_lin, ref_lin)

    # 4) multi-tile grid with a ragged last tile (B not a multiple of the block).
    B2 = 300
    x2 = jax.random.normal(k_x2, (B2, input_dim), dtype=jnp.float32)
    out2 = taylor_net_forward(x2, taylor_offsets, taylor_coefficients,
                              block_rows=128)
    jax.block_until_ready(out2)
    ref2 = taylor_net_reference(x2, taylor_offsets, taylor_coefficients)
    assert out2.shape == (B2,), out2.shape
    assert jnp.allclose(out2, ref2, rtol=1e-3, atol=1e-3), (out2, ref2)

    print("KERNEL_OK")
</pallas_src>

<mosaic_0001>
module attributes {stable_mosaic.version = 11 : i64} {
  func.func @k(%arg0: i32, %arg1: memref<8x128xf32, #tpu.memory_space<vmem>>, %arg2: memref<8x128xf32, #tpu.memory_space<vmem>>, %arg3: memref<8x128xf32, #tpu.memory_space<vmem>>) attributes {dimension_semantics = [#tpu.dimension_semantics<arbitrary>], iteration_bounds = array<i64: 2>, scalar_prefetch = 0 : i64, scratch_operands = 0 : i64, tpu.core_type = #tpu.core_type<tc>, window_params = [{transform_indices = @transform_0, window_bounds = array<i64: 8, 128>}, {pipeline_mode = #tpu.pipeline_mode<synchronous>, transform_indices = @transform_1, window_bounds = array<i64: 8, 128>}, {transform_indices = @transform_2, window_bounds = array<i64: 8, 128>}]} {
    %c0 = arith.constant 0 : index
    %c0_0 = arith.constant 0 : index
    %0 = vector.load %arg1[%c0, %c0_0] : memref<8x128xf32, #tpu.memory_space<vmem>>, vector<8x128xf32>
    %c0_1 = arith.constant 0 : index
    %c0_2 = arith.constant 0 : index
    %1 = vector.load %arg2[%c0_1, %c0_2] : memref<8x128xf32, #tpu.memory_space<vmem>>, vector<8x128xf32>
    %2 = arith.addf %0, %1 : vector<8x128xf32>
    %c0_3 = arith.constant 0 : index
    %c0_4 = arith.constant 0 : index
    %3 = vector.load %arg3[%c0_3, %c0_4] : memref<8x128xf32, #tpu.memory_space<vmem>>, vector<8x128xf32>
    tpu.vector_store %arg3[%c0_3, %c0_4], %2 {strides = array<i32>} : memref<8x128xf32, #tpu.memory_space<vmem>>, vector<8x128xf32>,
    return
  }
  func.func @transform_0(%arg0: i32) -> (i32, i32) {
    %c0_i32 = arith.constant 0 : i32
    %c0_i32_0 = arith.constant 0 : i32
    return %c0_i32, %arg0 : i32, i32
  }
  func.func @transform_1(%arg0: i32) -> (i32, i32) {
    %c0_i32 = arith.constant 0 : i32
    %c0_i32_0 = arith.constant 0 : i32
    %c0_i32_1 = arith.constant 0 : i32
    return %c0_i32, %c0_i32_0 : i32, i32
  }
  func.func @transform_2(%arg0: i32) -> (i32, i32) {
    %c0_i32 = arith.constant 0 : i32
    %c0_i32_0 = arith.constant 0 : i32
    return %c0_i32, %arg0 : i32, i32
  }
}

module attributes {stable_mosaic.version = 11 : i64} {
  func.func @kernel(%arg0: i32, %arg1: memref<1xf32, #tpu.memory_space<smem>>, %arg2: memref<8x16xf32, #tpu.memory_space<vmem>>, %arg3: memref<1x16xf32, #tpu.memory_space<vmem>>, %arg4: memref<16x16xf32, #tpu.memory_space<vmem>>, %arg5: memref<1x8xf32, #tpu.memory_space<vmem>>) attributes {dimension_semantics = [#tpu.dimension_semantics<parallel>], iteration_bounds = array<i64: 1>, scalar_prefetch = 0 : i64, scratch_operands = 0 : i64, tpu.core_type = #tpu.core_type<tc>, window_params = [{transform_indices = @transform_0, window_bounds = array<i64: 1>}, {transform_indices = @transform_1, window_bounds = array<i64: 8, 16>}, {pipeline_mode = #tpu.pipeline_mode<synchronous>, transform_indices = @transform_2, window_bounds = array<i64: 1, 16>}, {pipeline_mode = #tpu.pipeline_mode<synchronous>, transform_indices = @transform_3, window_bounds = array<i64: 16, 16>}, {transform_indices = @transform_4, window_bounds = array<i64: 1, 8>}]} {
    %c0 = arith.constant 0 : index
    %c0_0 = arith.constant 0 : index
    %0 = vector.load %arg2[%c0, %c0_0] : memref<8x16xf32, #tpu.memory_space<vmem>>, vector<8x16xf32>
    %c0_1 = arith.constant 0 : index
    %c0_2 = arith.constant 0 : index
    %1 = vector.load %arg3[%c0_1, %c0_2] : memref<1x16xf32, #tpu.memory_space<vmem>>, vector<1x16xf32>
    %c0_3 = arith.constant 0 : index
    %c0_4 = arith.constant 0 : index
    %2 = vector.load %arg4[%c0_3, %c0_4] : memref<16x16xf32, #tpu.memory_space<vmem>>, vector<16x16xf32>
    %cst = arith.constant dense<0.000000e+00> : vector<8x16xf32>
    %3 = tpu.matmul %0, %2, %cst {dimension_numbers = #tpu.dot_dimension_numbers<[1], [0], [0], [1], [0, 0, 1, 1], [], []>} : vector<8x16xf32>, vector<16x16xf32>, vector<8x16xf32> -> vector<8x16xf32>
    %4 = vector.broadcast %1 : vector<1x16xf32> to vector<8x16xf32>
    %5 = arith.addf %4, %3 : vector<8x16xf32>
    %6 = arith.mulf %0, %5 : vector<8x16xf32>
    %cst_5 = arith.constant dense<0.000000e+00> : vector<8xf32>
    %7 = vector.multi_reduction <add>, %6, %cst_5 [1] : vector<8x16xf32> to vector<8xf32>
    %c0_6 = arith.constant 0 : index
    %8 = memref.load %arg1[%c0_6] : memref<1xf32, #tpu.memory_space<smem>>
    %9 = vector.broadcast %8 : f32 to vector<8xf32>
    %10 = arith.addf %7, %9 : vector<8xf32>
    %c0_7 = arith.constant 0 : index
    %c0_8 = arith.constant 0 : index
    %11 = vector.load %arg5[%c0_7, %c0_8] : memref<1x8xf32, #tpu.memory_space<vmem>>, vector<1x8xf32>
    %12 = vector.shape_cast %11 : vector<1x8xf32> to vector<8xf32>
    %13 = vector.shape_cast %10 : vector<8xf32> to vector<1x8xf32>
    tpu.vector_store %arg5[%c0_7, %c0_8], %13 {strides = array<i32>} : memref<1x8xf32, #tpu.memory_space<vmem>>, vector<1x8xf32>,
    return
  }
  func.func @transform_0(%arg0: i32) -> i32 {
    %c0_i32 = arith.constant 0 : i32
    %c0_i32_0 = arith.constant 0 : i32
    return %c0_i32 : i32
  }
  func.func @transform_1(%arg0: i32) -> (i32, i32) {
    %c0_i32 = arith.constant 0 : i32
    %c0_i32_0 = arith.constant 0 : i32
    return %arg0, %c0_i32 : i32, i32
  }
  func.func @transform_2(%arg0: i32) -> (i32, i32) {
    %c0_i32 = arith.constant 0 : i32
    %c0_i32_0 = arith.constant 0 : i32
    %c0_i32_1 = arith.constant 0 : i32
    return %c0_i32, %c0_i32_0 : i32, i32
  }
  func.func @transform_3(%arg0: i32) -> (i32, i32) {
    %c0_i32 = arith.constant 0 : i32
    %c0_i32_0 = arith.constant 0 : i32
    %c0_i32_1 = arith.constant 0 : i32
    return %c0_i32, %c0_i32_0 : i32, i32
  }
  func.func @transform_4(%arg0: i32) -> (i32, i32) {
    %c0_i32 = arith.constant 0 : i32
    %c0_i32_0 = arith.constant 0 : i32
    return %c0_i32, %arg0 : i32, i32
  }
}

</mosaic_0001>

<bundles_post_ra>
// kernel: tpu_custom_call.1
= control target key start
LH: loop header
LB: loop body
LE: loop exit
PB: predicated region body
PF: predicated region fallthrough
CT: control target
= control target key end

     0   :  { %7 = vsyncpa [#allocation3], 0  ;;  %s633_s0 = inlined_call_operand.hbm [shape: f32[8,256], index: 0, kind: input, shape index: {}]   ;;  %s634_s1 = inlined_call_operand.hbm [shape: f32[8,128], index: 1, kind: input, shape index: {}]   ;;  %s635_s2 = inlined_call_operand.hbm [shape: f32[8,256], index: 2, kind: output, shape index: {}]  }
   0x1   :  { %9 = vsyncpa [#allocation3 + $0x1], 0 }
   0x2   :  { %10 = vsyncpa [#allocation6], 0 }
   0x3   :  { %11 = vsyncpa [#allocation4], 0 }
   0x4   :  { %13 = vsyncpa [#allocation4 + $0x1], 0  ;;  %s495_s9 = smov 0   ;;  %s497_s10 = smov 0  }
   0x5   :  { %s499_s11 = smov 0   ;;  %s501_s12 = smov 0  }
   0x6 LB: > { %s516_s13 = sadd.s32 4294967295, %s477_s12   ;;  %s276_s14 = sadd.s32 4294967294, %s477_s12   ;;  %s477_s12 = sphi %s501_s12, %s645_s12   ;;  %s473_s11 = sphi %s499_s11, %s644_s11   ;;  %s469_s10 = sphi %s497_s10, %s643_s10   ;;  %s465_s9 = sphi %s495_s9, %s642_s9  }
   0x7   : > { %p39_p0 = scmp.ne.s32.totalorder %s469_s10, %s465_s9  ;;  %p40_p1 = scmp.eq.s32.totalorder %s516_s13, 0 }
   0x8   : > { %p84_p2 = scmp.eq.s32.totalorder %s516_s13, 1  ;;  %p90_p3 = scmp.eq.s32.totalorder %s276_s14, 1 }
   0x9   : > { %p525_p4 = por %p40_p1, %p39_p0  ;;  %p277_p5 = scmp.ge.s32.totalorder %s477_s12, 1 }
   0xa   : > { %p530_p6 = por %p90_p3, %p39_p0  ;;  %p97_p7 = scmp.lt.s32.totalorder %s477_s12, 3 }
   0xb   : > { %s109_s19 = sshll.u32 %s634_s1, 4  ;;  %s479_s21 = smov [#allocation5]   ;;  %s110_s19 = int_to_ptr.hbm [resolvable:$true] %s109_s19 }
   0xc   : > { %p538_p8 = pnand %p277_p5, %p97_p7  ;;  %s111_s22 = sshll.u32 %s479_s21, 4  ;;  %s112_s22 = int_to_ptr.vmem [resolvable:$true] %s111_s22 }
   0xd   : > { %s548_s23 = sadd.s32 1, %s477_s12   ;;  %s26_s24 = sadd.s32 1, %s473_s11 }
   0xe   : > { %p298_p10 = pneg %p538_p8  ;;  %s23_s25 = ssub.s32 %s477_s12, %s548_s23 }
   0xf   : > { %p24_p12 = scmp.eq.s32.totalorder %s23_s25, 0  ;;  %p33_p13 = scmp.ne.s32.totalorder %s473_s11, %s469_s10 }
  0x10   : > { %p299_p11 = pnand %p298_p10, %p40_p1  ;;  %p34_p0 = scmp.eq.s32.totalorder %s477_s12, 0 }
  0x11   : > { %s557_s26 = scalar_select %p24_p12, %s473_s11, %s26_s24  }
  0x12   : > { %301 = dma.hbm_to_vmem [thread:$0]  (!%p299_p11), %s110_s19, 128, %s112_s22, [#allocation6]  }
  0x13   : > { %p561_p3 = por %p84_p2, %p33_p13  ;;  %p311_p5 = scmp.lt.s32.totalorder %s477_s12, 2 }
  0x14   : > { %s122_s28 = sand.u32 1, %s473_s11   ;;  %s281_s29 = sshll.u32 %s477_s12, 3 }
  0x15   : > { %p35_p7 = por %p34_p0, %p33_p13  ;;  %s280_s30 = sshll.u32 %s122_s28, 3 }
  0x16   : > { %s130_s5 = scalar_lea.hbm %s633_s0, %s281_s29  ;;  %s126_s7 = scalar_lea.vmem [#allocation2], %s280_s30 }
  0x17   : > { %s132_s6 = sshll.u32 %s130_s5, 4  ;;  %s134_s8 = sshll.u32 %s126_s7, 4  ;;  %s133_s6 = int_to_ptr.hbm [resolvable:$true] %s132_s6  ;;  %s135_s8 = int_to_ptr.vmem [resolvable:$true] %s134_s8 }
  0x18   : > { %p571_p10 = pnand %p311_p5, %p35_p7  ;;  %s123_s17 = scalar_lea.sflag [#allocation3], %s122_s28 }
  0x19   : > { %s377_s18 = sshra.s32 %s133_s6, 4  ;;  %s384_s24 = scalar_lea.hbm %s633_s0, 16  ;;  %s378_s18 = int_to_ptr.hbm [resolvable:$true] %s377_s18 }
  0x1a   : > { %s379_s19 = scalar_lea.hbm %s378_s18, 8  ;;  %p381_p11 = pneg %p571_p10 }
  0x1b   : > { %p380_p2 = scmp.ne.s32.totalorder %s378_s18, %s379_s19  ;;  %p385_p0 = scmp.lt.s32.totalorder %s378_s18, %s633_s0 }
  0x1c   : > { %p386_p5 = scmp.lt.s32.totalorder %s384_s24, %s379_s19 }
  0x1d   : > { %p382_p12 = pnand %p381_p11, %p380_p2 }
  0x1e   : > { %p387_p7 = por %p386_p5, %p385_p0 }
  0x1f   : > { %p383_p13 = pneg %p382_p12 }
  0x21   : > { %p388_p9 = pnand %p387_p7, %p383_p13 }
  0x23   : > { %391 = shalt.err (!%p388_p9)
}
  0x24   : > { %305 = dma.hbm_to_vmem [thread:$0]  (!%p571_p10), %s133_s6, 128, %s135_s8, %s123_s17  }
  0x25   : > { %143 = sbr.rel (%p538_p8) target bundleno = 60 (0x3c), region = 28  ;;  %s588_s28 = sand.u32 (!%p538_p8), 1, %s469_s10  }
  0x26   : > { %s283_s30 = sshll.u32 (!%p538_p8), %s588_s28, 3  ;;  %s146_s3 = scalar_lea.sflag (!%p538_p8), [#allocation3], %s588_s28 }
  0x27   : > { %s149_s4 = scalar_lea.vmem (!%p538_p8), [#allocation2], %s283_s30 }
  0x2a   : > { %452 = dma.done.wait (%p525_p4), %s146_s3, 128  }
  0x2b   : > { %454 = vsyncadd (%p525_p4), %s146_s3, 4294967168 }
  0x2c   : > { %456 = dma.done.wait (%p40_p1), [#allocation6], 128  }
  0x2d   : > { %458 = vsyncadd (%p40_p1), [#allocation6], 4294967168  ;;  %s287_s20 = sshll.u32 %s516_s13, 3  ;;  %s175_s8 = scalar_lea.vmem [#allocation7], %s283_s30  ;;  %v176_v0 = vld [vmem:[%s149_s4] sm:$0xff]  ;;  %v177_v1 = vld [vmem:[#allocation5] sm:$0xff] }
  0x2e   : > { %s191_s7 = scalar_lea.hbm %s635_s2, %s287_s20  ;;  %s193_s14 = sshll.u32 %s175_s8, 4  ;;  %v178_v2 = vadd.f32 %v177_v1, %v176_v0  ;;  %s194_s14 = int_to_ptr.vmem [resolvable:$true] %s193_s14 }
  0x2f   : > { %s195_s17 = sshll.u32 %s191_s7, 4  ;;  %s181_s15 = scalar_lea.sflag [#allocation4], %s588_s28  ;;  %s196_s17 = int_to_ptr.hbm [resolvable:$true] %s195_s17 }
  0x30   : > { %179 = vst [vmem:[%s175_s8] sm:$0xff] %v178_v2  ;;  %s421_s18 = sshra.s32 %s196_s17, 4  ;;  %s427_s22 = scalar_lea.hbm %s635_s2, 16  ;;  %s422_s18 = int_to_ptr.hbm [resolvable:$true] %s421_s18 }
  0x31   : > { %s423_s19 = scalar_lea.hbm %s422_s18, 8  ;;  %p428_p9 = scmp.lt.s32.totalorder %s422_s18, %s635_s2 }
  0x32   : > { %p424_p1 = scmp.ne.s32.totalorder %s422_s18, %s423_s19  ;;  %p429_p10 = scmp.lt.s32.totalorder %s427_s22, %s423_s19 }
  0x34   : > { %p425_p4 = pnand %p424_p1, %p561_p3  ;;  %p430_p2 = por %p429_p10, %p428_p9 }
  0x36   : > { %p426_p8 = pneg %p425_p4 }
  0x38   : > { %p431_p11 = pnand %p430_p2, %p426_p8 }
  0x3a   : > { %434 = shalt.err (!%p431_p11)
}
  0x3b   : > { %296 = dma.vmem_to_hbm [thread:$0]  (%p561_p3), %s194_s14, 128, %s196_s17, %s181_s15  }
  0x3c PF: > { %s207_s29 = sand.u32 1, %s465_s9   ;;  %p641_p12 = scmp.ge.s32.totalorder %s477_s12, 2 }
  0x3d   : > { %s208_s28 = scalar_lea.sflag [#allocation4], %s207_s29 }
  0x3e   : > { %p307_p13 = pnand %p641_p12, %p530_p6 }
  0x40   : > { %p308_p0 = pneg %p307_p13 }
  0x42   : > { %460 = dma.done.wait (%p308_p0), %s208_s28, 128  }
  0x43   : > { %462 = vsyncadd (%p308_p0), %s208_s28, 4294967168  ;;  %p16_p5 = scmp.ge.s32.totalorder %s548_s23, 4   ;;  %s642_s9 = smov %s469_s10 }
  0x44   : > { %s643_s10 = smov %s473_s11  ;;  %s644_s11 = smov %s557_s26 }
  0x45   : > { %s645_s12 = smov %s548_s23  ;;  %18 = sbr.rel (!%p16_p5) target bundleno = 6 (0x6), region = 77 }
  0x4a   :  { %214 = vsyncpa [#allocation3], 1 }
  0x4b   :  { %216 = vsyncpa [#allocation3 + $0x1], 1 }
  0x4c   :  { %217 = vsyncpa [#allocation6], 1 }
  0x4d   :  { %218 = vsyncpa [#allocation4], 1 }
  0x4e   :  { %220 = vsyncpa [#allocation4 + $0x1], 1 }

// kernel: _taylor_forward_impl.1
= control target key start
LH: loop header
LB: loop body
LE: loop exit
PB: predicated region body
PF: predicated region fallthrough
CT: control target
= control target key end

     0   :  { %vm23_vm0 = vcmask 130048   ;;  %s154_s0 = inlined_call_operand.<no memory space> [shape: f32[1], index: 0, kind: input, shape index: {}]   ;;  %s155_s1 = inlined_call_operand.vmem [shape: f32[8,16], index: 1, kind: input, shape index: {}]   ;;  %s156_s2 = inlined_call_operand.vmem [shape: f32[1,16], index: 2, kind: input, shape index: {}]   ;;  %s157_s3 = inlined_call_operand.vmem [shape: f32[16,16], index: 3, kind: input, shape index: {}]   ;;  %s158_s4 = inlined_call_operand.hbm [shape: f32[1,8], index: 4, kind: output, shape index: {}]  }
   0x1   :  { %v22_v0 = vld [vmem:[%s157_s3 + $0x8] sm:$0xff]  ;;  %v21_v1 = vld [vmem:[%s157_s3] sm:$0xff] }
   0x2   :  { %41 = vmatpush.msra.mxu0 %v22_v0  ;;  %v19_v2 = vld [vmem:[%s155_s1] sm:$0xff] }
   0x3   :  { %10 = vsyncpa [#allocation4], 0  ;;  %v83_v3 = vld [vmem:[%s156_s2] ss:$0 sm:$0xff]  ;;  %v59_v8 = vlaneseq  ;;  %v56_v9 = vstv %s154_s0  ;;  %s110_s1 = smov [#allocation3]   ;;  %s72_s27 = sshll.u32 %s158_s4, 4  ;;  %s73_s27 = int_to_ptr.hbm [resolvable:$true] %s72_s27 }
   0x4   :  { %42 = vmatpush.msra.mxu0 %v21_v1  ;;  %s70_s24 = sshll.u32 %s110_s1, 4  ;;  %vm63_vm1 = vcmask 57344   ;;  %s71_s24 = int_to_ptr.vmem [resolvable:$true] %s70_s24 }
   0x5   :  { %81 = vmatmul.msk.f32.vlgmr.msra.gmra.mxu0 %vm23_vm0, %v19_v2  ;;  %v60_v10 = vand.u32 127, %v59_v8 }
  0x82   :  { %v44_v4 = vpop.f32.mrf.mxu0 }
  0x83   :  { %v50_v5 = vadd.f32 %v83_v3, %v44_v4 }
  0x85   :  { %v51_v6 = vmul.f32 %v50_v5, %v19_v2 }
  0x87   :  { %v52_v7 = vsel %vm23_vm0, %v51_v6, 0.0 }
  0x88   :  { %53 = vadd.xlane.f32.xlu0 %v52_v7 }
  0xfb   :  { %v54_v11 = vpop.xlane.xlu0 %53 }
  0xfc   :  { %v57_v12 = vadd.f32 %v56_v9, %v54_v11 }
  0xfe   :  { %v61_v13 = vperm.slane %v57_v12, %v60_v10 }
 0x100   :  { %64 = vst.msk [vmem:[#allocation3] sm:$0x1] %vm63_vm1, %v61_v13 }
 0x101   :  { %75 = dma.vmem_to_hbm [thread:$0]  %s71_s24, 16, %s73_s27, [#allocation4]  }
 0x102   :  { %108 = dma.done.wait [#allocation4], 16  }
 0x103   :  { %109 = vsyncadd [#allocation4], 4294967280 }
 0x104   :  { %80 = vsyncpa [#allocation4], 1 }

</bundles_post_ra>
